<compile_context>
chip_gen: v7x
topology: tpu7x:2x2x1
jax: 0.10.0
libtpu: 0.0.40
codegen_flags: <defaults>
</compile_context>

<pallas_src>
import functools
import math

import jax
import jax.numpy as jnp
from jax.experimental import pallas as pl
from jax.experimental.pallas import tpu as pltpu

BN_EPS = 1e-5


def _conv_stats_kernel(x_ref, w_ref, bias_ref, mask_ref, conv_ref, s1_ref, s2_ref, *, W):
    """Phase 1: conv as a single GEMM + per-batch BN partial stats.

    x_ref:    (1, Cin, HWpad) bf16  flat zero-padded image, HWpad = (H+2p)*W + 2p
    w_ref:    (Cout, K*K*Cin) bf16  w[co, (kh*K+kw)*Cin + cin] = w_conv[co, cin, kh, kw]
    bias_ref: (Cout, 1)       f32
    mask_ref: (K, HW)         bf16  width-validity mask per kw (zeros wrapped reads), values in {0,1}
    conv_ref: (1, Cout, HW)   f32   conv output (NCHW-flat, lane-dense)
    s1_ref:   (1, Cout, 1)    f32   per-channel sum over HW for this batch
    s2_ref:   (1, Cout, 1)    f32   per-channel sum of squares over HW for this batch
    """
    K, HW = mask_ref.shape
    x = x_ref[0]                # (Cin, HWpad) bf16
    masks = mask_ref[...]       # (K, HW)      bf16, exact 0/1

    # In-VMEM im2col: for output position m = r*W + c and tap (kh, kw) the source element of the
    # flat padded image is x[m + kh*W + kw]; reads that wrap across a row in the W direction are
    # zeroed by the per-kw mask (H-direction padding is real zeros in the input).  Mask values are
    # exactly 0/1 so the bf16 multiply is exact.
    pieces = []
    for kh in range(K):
        for kw in range(K):
            off = kh * W + kw                                   # static python int
            pieces.append(x[:, off:off + HW] * masks[kw:kw + 1, :])   # (Cin, HW) bf16
    cols = jnp.concatenate(pieces, axis=0)                      # (K*K*Cin, HW) bf16

    # Single MXU GEMM, contraction = K*K*Cin, f32 accumulation.
    conv = jnp.dot(w_ref[...], cols, preferred_element_type=jnp.float32)   # (Cout, HW)
    conv = conv + bias_ref[...]                                            # (Cout, 1) broadcast

    conv_ref[0] = conv
    # BN partial stats straight from the in-register value (no scratch round trip).
    s1_ref[0] = jnp.sum(conv, axis=1, keepdims=True)
    s2_ref[0] = jnp.sum(conv * conv, axis=1, keepdims=True)


def _bn_film_kernel(conv_ref, g_ref, h_ref, tcol_ref, wt_ref, bt_ref, out_ref):
    """Phase 2: BatchNorm (pre-folded affine) + time-FiLM as one per-channel FMA.

    conv_ref: (1, Cout, HW) f32
    g_ref:    (Cout, 1) f32       rstd * gamma
    h_ref:    (Cout, 1) f32       beta - mean * rstd * gamma
    tcol_ref: (1, Tdim, 1) f32    time embedding for this batch row (column vector)
    wt_ref:   (2*Cout, Tdim) f32  time-MLP Linear weight (PyTorch layout)
    bt_ref:   (2*Cout, 1) f32     time-MLP Linear bias
    out_ref:  (1, Cout, HW) f32
    """
    cout = g_ref.shape[0]
    conv = conv_ref[0]                                    # (Cout, HW)

    # Time MLP (SiLU -> Linear) once per batch row, in column form so scale/shift are already
    # (Cout, 1) and broadcast along lanes without any in-kernel transpose.
    tcol = tcol_ref[0]                                    # (Tdim, 1)
    silu = tcol * jax.nn.sigmoid(tcol)
    te = jnp.dot(wt_ref[...], silu, preferred_element_type=jnp.float32) + bt_ref[...]  # (2*Cout, 1)
    scale = te[:cout, :]                                  # (Cout, 1)
    shift = te[cout:, :]                                  # (Cout, 1)

    # BN(x)*(scale+1)+shift == x*(g*(scale+1)) + (h*(scale+1)+shift)
    sp1 = scale + 1.0
    a = g_ref[...] * sp1
    b = h_ref[...] * sp1 + shift
    out_ref[0] = (conv * a + b).astype(out_ref.dtype)


def conv_withtime(x_nchw, t, params, kernel_size, mxu_dtype=jnp.bfloat16):
    """Forward of Conv_withtime. x_nchw: (B, Cin, H, W), t: (B, time_dim) -> (B, Cout, H, W)."""
    B, Cin, H, W = x_nchw.shape
    K = kernel_size
    assert K % 2 == 1, "odd kernel_size required (padding=K//2 'same' conv)"
    # TODO(synk): even kernel_size (asymmetric output with padding=K//2) is not supported by the
    #             flattened-shift scheme; it would need a different windowing.
    p = K // 2
    HW = H * W
    HWpad = (H + 2 * p) * W + 2 * p

    w_conv = params["w_conv"]                             # (Cout, Cin, K, K) — PyTorch layout
    Cout = w_conv.shape[0]
    Tdim = params["w_time"].shape[1]

    # ---- layout glue (pad/reshape/cast only — no im2col materialization) ----
    x32 = x_nchw.astype(jnp.float32)
    x_flat = jnp.pad(x32, ((0, 0), (0, 0), (p, p), (0, 0))).reshape(B, Cin, (H + 2 * p) * W)
    x_flat = jnp.pad(x_flat, ((0, 0), (0, 0), (p, p))).astype(mxu_dtype)      # (B, Cin, HWpad)

    w_mat = jnp.transpose(w_conv, (0, 2, 3, 1)).reshape(Cout, K * K * Cin).astype(mxu_dtype)
    bias = params["b_conv"].reshape(Cout, 1).astype(jnp.float32)

    col = jnp.arange(HW, dtype=jnp.int32) % W
    mask = jnp.stack([((col + kw - p) >= 0) & ((col + kw - p) < W) for kw in range(K)])
    mask = mask.astype(mxu_dtype)                                             # (K, HW), exact 0/1

    # ---- phase 1: conv GEMM + per-batch BN partial sums (grid parallel over batch) ----
    conv, s1, s2 = pl.pallas_call(
        functools.partial(_conv_stats_kernel, W=W),
        grid=(B,),
        in_specs=[
            pl.BlockSpec((1, Cin, HWpad), lambda b: (b, 0, 0)),
            pl.BlockSpec((Cout, K * K * Cin), lambda b: (0, 0)),
            pl.BlockSpec((Cout, 1), lambda b: (0, 0)),
            pl.BlockSpec((K, HW), lambda b: (0, 0)),
        ],
        out_specs=(
            pl.BlockSpec((1, Cout, HW), lambda b: (b, 0, 0)),
            pl.BlockSpec((1, Cout, 1), lambda b: (b, 0, 0)),
            pl.BlockSpec((1, Cout, 1), lambda b: (b, 0, 0)),
        ),
        out_shape=(
            jax.ShapeDtypeStruct((B, Cout, HW), jnp.float32),
            jax.ShapeDtypeStruct((B, Cout, 1), jnp.float32),
            jax.ShapeDtypeStruct((B, Cout, 1), jnp.float32),
        ),
        compiler_params=pltpu.CompilerParams(dimension_semantics=("parallel",)),
    )(x_flat, w_mat, bias, mask)

    # ---- tiny JAX glue: per-channel mean / rstd and pre-folded BN affine (O(Cout) work) ----
    n = float(B * HW)
    mean = jnp.sum(s1, axis=0) / n                                            # (Cout, 1)
    var = jnp.maximum(jnp.sum(s2, axis=0) / n - mean * mean, 0.0)
    rstd = jax.lax.rsqrt(var + BN_EPS)
    gamma = params["gamma"].reshape(Cout, 1).astype(jnp.float32)
    beta = params["beta"].reshape(Cout, 1).astype(jnp.float32)
    g = rstd * gamma                                                          # (Cout, 1)
    h = beta - mean * g                                                       # (Cout, 1)

    tcol = t.astype(jnp.float32)[:, :, None]                                  # (B, Tdim, 1)
    w_time = params["w_time"].astype(jnp.float32)                             # (2*Cout, Tdim)
    b_time = params["b_time"].reshape(2 * Cout, 1).astype(jnp.float32)

    # ---- phase 2: BN + FiLM (grid parallel over batch, lane-dense NCHW-flat output) ----
    out = pl.pallas_call(
        _bn_film_kernel,
        grid=(B,),
        in_specs=[
            pl.BlockSpec((1, Cout, HW), lambda b: (b, 0, 0)),
            pl.BlockSpec((Cout, 1), lambda b: (0, 0)),
            pl.BlockSpec((Cout, 1), lambda b: (0, 0)),
            pl.BlockSpec((1, Tdim, 1), lambda b: (b, 0, 0)),
            pl.BlockSpec((2 * Cout, Tdim), lambda b: (0, 0)),
            pl.BlockSpec((2 * Cout, 1), lambda b: (0, 0)),
        ],
        out_specs=pl.BlockSpec((1, Cout, HW), lambda b: (b, 0, 0)),
        out_shape=jax.ShapeDtypeStruct((B, Cout, HW), jnp.float32),
        compiler_params=pltpu.CompilerParams(dimension_semantics=("parallel",)),
    )(conv, g, h, tcol, w_time, b_time)

    # Output is already NCHW-flat: just reshape (no transpose).
    return out.reshape(B, Cout, H, W)


def reference(x_nchw, t, params, kernel_size, mxu_dtype=None):
    """Pure-JAX reference of the PyTorch forward (BN in training mode).

    If mxu_dtype is given, the conv inputs are rounded to that dtype first (the only deviation
    the Pallas kernel makes from pure-f32 math); all arithmetic stays f32.
    """
    K = kernel_size
    p = K // 2
    w = params["w_conv"].astype(jnp.float32)
    xc = x_nchw.astype(jnp.float32)
    if mxu_dtype is not None:
        xc = xc.astype(mxu_dtype).astype(jnp.float32)
        w = w.astype(mxu_dtype).astype(jnp.float32)
    Cout = w.shape[0]
    conv = jax.lax.conv_general_dilated(
        xc, w, window_strides=(1, 1), padding=[(p, p), (p, p)],
        dimension_numbers=("NCHW", "OIHW", "NCHW"),
        precision=jax.lax.Precision.HIGHEST)
    conv = conv + params["b_conv"].reshape(1, Cout, 1, 1)
    mean = conv.mean(axis=(0, 2, 3), keepdims=True)
    var = ((conv - mean) ** 2).mean(axis=(0, 2, 3), keepdims=True)
    xn = (conv - mean) / jnp.sqrt(var + BN_EPS)
    xn = xn * params["gamma"].reshape(1, Cout, 1, 1) + params["beta"].reshape(1, Cout, 1, 1)
    silu = t * jax.nn.sigmoid(t)
    te = jnp.dot(silu, params["w_time"].T, precision=jax.lax.Precision.HIGHEST) + params["b_time"]
    scale, shift = te[:, :Cout], te[:, Cout:]
    return xn * (scale[:, :, None, None] + 1.0) + shift[:, :, None, None]


def init_params(key, embed_dim, out_dim, time_dim, kernel_size):
    k1, k2, k3, k4 = jax.random.split(key, 4)
    fan_in_conv = embed_dim * kernel_size * kernel_size
    fan_in_lin = time_dim
    return {
        "w_conv": jax.random.normal(k1, (out_dim, embed_dim, kernel_size, kernel_size),
                                    jnp.float32) / math.sqrt(fan_in_conv),
        "b_conv": jax.random.normal(k2, (out_dim,), jnp.float32) * 0.02,
        "gamma": jnp.ones((out_dim,), jnp.float32),
        "beta": jnp.zeros((out_dim,), jnp.float32),
        "w_time": jax.random.normal(k3, (out_dim * 2, time_dim),
                                    jnp.float32) / math.sqrt(fan_in_lin),
        "b_time": jax.random.normal(k4, (out_dim * 2,), jnp.float32) * 0.02,
    }


if __name__ == "__main__":
    # Small deterministic example: B=2, embed_dim=4, H=W=16, out_dim=8, time_dim=32, K=3
    B, Cin, H, W = 2, 4, 16, 16
    Cout, Tdim, K = 8, 32, 3

    key = jax.random.PRNGKey(0)
    kx, kt, kp = jax.random.split(key, 3)
    x = jax.random.normal(kx, (B, Cin, H, W), jnp.float32)
    t = jax.random.normal(kt, (B, Tdim), jnp.float32)
    params = init_params(kp, Cin, Cout, Tdim, K)

    fwd = jax.jit(functools.partial(conv_withtime, kernel_size=K))
    y = fwd(x, t, params)
    jax.block_until_ready(y)
    assert y.shape == (B, Cout, H, W)

    # Tight check vs a reference that only differs by the bf16 rounding of the conv MXU inputs.
    y_ref_bf16 = reference(x, t, params, K, mxu_dtype=jnp.bfloat16)
    err = float(jnp.max(jnp.abs(y - y_ref_bf16)))
    assert jnp.allclose(y, y_ref_bf16, rtol=3e-3, atol=3e-3), err

    # Loose sanity check vs the pure-f32 PyTorch-equivalent math (bf16 MXU inputs in the kernel).
    y_ref_f32 = reference(x, t, params, K)
    err32 = float(jnp.max(jnp.abs(y - y_ref_f32)))
    assert jnp.allclose(y, y_ref_f32, rtol=1.5e-1, atol=1.5e-1), err32

    print("KERNEL_OK")
</pallas_src>

<mosaic_0001>
module attributes {stable_mosaic.version = 11 : i64} {
  func.func @_conv_stats_kernel(%arg0: i32, %arg1: memref<1x4x290xbf16, #tpu.memory_space<vmem>>, %arg2: memref<8x36xbf16, #tpu.memory_space<vmem>>, %arg3: memref<8x1xf32, #tpu.memory_space<vmem>>, %arg4: memref<3x256xbf16, #tpu.memory_space<vmem>>, %arg5: memref<1x8x256xf32, #tpu.memory_space<vmem>>, %arg6: memref<1x8x1xf32, #tpu.memory_space<vmem>>, %arg7: memref<1x8x1xf32, #tpu.memory_space<vmem>>) attributes {dimension_semantics = [#tpu.dimension_semantics<parallel>], iteration_bounds = array<i64: 2>, scalar_prefetch = 0 : i64, scratch_operands = 0 : i64, tpu.core_type = #tpu.core_type<tc>, window_params = [{transform_indices = @transform_0, window_bounds = array<i64: 1, 4, 290>}, {pipeline_mode = #tpu.pipeline_mode<synchronous>, transform_indices = @transform_1, window_bounds = array<i64: 8, 36>}, {pipeline_mode = #tpu.pipeline_mode<synchronous>, transform_indices = @transform_2, window_bounds = array<i64: 8, 1>}, {pipeline_mode = #tpu.pipeline_mode<synchronous>, transform_indices = @transform_3, window_bounds = array<i64: 3, 256>}, {transform_indices = @transform_4, window_bounds = array<i64: 1, 8, 256>}, {transform_indices = @transform_5, window_bounds = array<i64: 1, 8, 1>}, {transform_indices = @transform_6, window_bounds = array<i64: 1, 8, 1>}]} {
    %c0 = arith.constant 0 : index
    %c0_0 = arith.constant 0 : index
    %c0_1 = arith.constant 0 : index
    %0 = vector.load %arg1[%c0, %c0_0, %c0_1] : memref<1x4x290xbf16, #tpu.memory_space<vmem>>, vector<1x4x290xbf16>
    %1 = vector.shape_cast %0 : vector<1x4x290xbf16> to vector<4x290xbf16>
    %c0_2 = arith.constant 0 : index
    %c0_3 = arith.constant 0 : index
    %2 = vector.load %arg4[%c0_2, %c0_3] : memref<3x256xbf16, #tpu.memory_space<vmem>>, vector<3x256xbf16>
    %3 = vector.extract_strided_slice %1 {offsets = [0, 0], sizes = [4, 256], strides = [1, 1]} : vector<4x290xbf16> to vector<4x256xbf16>
    %4 = vector.extract_strided_slice %2 {offsets = [0, 0], sizes = [1, 256], strides = [1, 1]} : vector<3x256xbf16> to vector<1x256xbf16>
    %5 = vector.broadcast %4 : vector<1x256xbf16> to vector<4x256xbf16>
    %6 = arith.mulf %3, %5 : vector<4x256xbf16>
    %7 = vector.extract_strided_slice %1 {offsets = [0, 1], sizes = [4, 256], strides = [1, 1]} : vector<4x290xbf16> to vector<4x256xbf16>
    %8 = vector.extract_strided_slice %2 {offsets = [1, 0], sizes = [1, 256], strides = [1, 1]} : vector<3x256xbf16> to vector<1x256xbf16>
    %9 = vector.broadcast %8 : vector<1x256xbf16> to vector<4x256xbf16>
    %10 = arith.mulf %7, %9 : vector<4x256xbf16>
    %11 = vector.extract_strided_slice %1 {offsets = [0, 2], sizes = [4, 256], strides = [1, 1]} : vector<4x290xbf16> to vector<4x256xbf16>
    %12 = vector.extract_strided_slice %2 {offsets = [2, 0], sizes = [1, 256], strides = [1, 1]} : vector<3x256xbf16> to vector<1x256xbf16>
    %13 = vector.broadcast %12 : vector<1x256xbf16> to vector<4x256xbf16>
    %14 = arith.mulf %11, %13 : vector<4x256xbf16>
    %15 = vector.extract_strided_slice %1 {offsets = [0, 16], sizes = [4, 256], strides = [1, 1]} : vector<4x290xbf16> to vector<4x256xbf16>
    %16 = vector.extract_strided_slice %2 {offsets = [0, 0], sizes = [1, 256], strides = [1, 1]} : vector<3x256xbf16> to vector<1x256xbf16>
    %17 = vector.broadcast %16 : vector<1x256xbf16> to vector<4x256xbf16>
    %18 = arith.mulf %15, %17 : vector<4x256xbf16>
    %19 = vector.extract_strided_slice %1 {offsets = [0, 17], sizes = [4, 256], strides = [1, 1]} : vector<4x290xbf16> to vector<4x256xbf16>
    %20 = vector.extract_strided_slice %2 {offsets = [1, 0], sizes = [1, 256], strides = [1, 1]} : vector<3x256xbf16> to vector<1x256xbf16>
    %21 = vector.broadcast %20 : vector<1x256xbf16> to vector<4x256xbf16>
    %22 = arith.mulf %19, %21 : vector<4x256xbf16>
    %23 = vector.extract_strided_slice %1 {offsets = [0, 18], sizes = [4, 256], strides = [1, 1]} : vector<4x290xbf16> to vector<4x256xbf16>
    %24 = vector.extract_strided_slice %2 {offsets = [2, 0], sizes = [1, 256], strides = [1, 1]} : vector<3x256xbf16> to vector<1x256xbf16>
    %25 = vector.broadcast %24 : vector<1x256xbf16> to vector<4x256xbf16>
    %26 = arith.mulf %23, %25 : vector<4x256xbf16>
    %27 = vector.extract_strided_slice %1 {offsets = [0, 32], sizes = [4, 256], strides = [1, 1]} : vector<4x290xbf16> to vector<4x256xbf16>
    %28 = vector.extract_strided_slice %2 {offsets = [0, 0], sizes = [1, 256], strides = [1, 1]} : vector<3x256xbf16> to vector<1x256xbf16>
    %29 = vector.broadcast %28 : vector<1x256xbf16> to vector<4x256xbf16>
    %30 = arith.mulf %27, %29 : vector<4x256xbf16>
    %31 = vector.extract_strided_slice %1 {offsets = [0, 33], sizes = [4, 256], strides = [1, 1]} : vector<4x290xbf16> to vector<4x256xbf16>
    %32 = vector.extract_strided_slice %2 {offsets = [1, 0], sizes = [1, 256], strides = [1, 1]} : vector<3x256xbf16> to vector<1x256xbf16>
    %33 = vector.broadcast %32 : vector<1x256xbf16> to vector<4x256xbf16>
    %34 = arith.mulf %31, %33 : vector<4x256xbf16>
    %35 = vector.extract_strided_slice %1 {offsets = [0, 34], sizes = [4, 256], strides = [1, 1]} : vector<4x290xbf16> to vector<4x256xbf16>
    %36 = vector.extract_strided_slice %2 {offsets = [2, 0], sizes = [1, 256], strides = [1, 1]} : vector<3x256xbf16> to vector<1x256xbf16>
    %37 = vector.broadcast %36 : vector<1x256xbf16> to vector<4x256xbf16>
    %38 = arith.mulf %35, %37 : vector<4x256xbf16>
    %39 = tpu.concatenate %6, %10, %14, %18, %22, %26, %30, %34, %38 in 0 : vector<4x256xbf16>, vector<4x256xbf16>, vector<4x256xbf16>, vector<4x256xbf16>, vector<4x256xbf16>, vector<4x256xbf16>, vector<4x256xbf16>, vector<4x256xbf16>, vector<4x256xbf16> -> vector<36x256xbf16>
    %c0_4 = arith.constant 0 : index
    %c0_5 = arith.constant 0 : index
    %40 = vector.load %arg2[%c0_4, %c0_5] : memref<8x36xbf16, #tpu.memory_space<vmem>>, vector<8x36xbf16>
    %cst = arith.constant dense<0.000000e+00> : vector<8x256xf32>
    %41 = tpu.matmul %40, %39, %cst {dimension_numbers = #tpu.dot_dimension_numbers<[1], [0], [0], [1], [0, 0, 1, 1], [], []>} : vector<8x36xbf16>, vector<36x256xbf16>, vector<8x256xf32> -> vector<8x256xf32>
    %c0_6 = arith.constant 0 : index
    %c0_7 = arith.constant 0 : index
    %42 = vector.load %arg3[%c0_6, %c0_7] : memref<8x1xf32, #tpu.memory_space<vmem>>, vector<8x1xf32>
    %43 = vector.broadcast %42 : vector<8x1xf32> to vector<8x256xf32>
    %44 = arith.addf %41, %43 : vector<8x256xf32>
    %c0_8 = arith.constant 0 : index
    %c0_9 = arith.constant 0 : index
    %c0_10 = arith.constant 0 : index
    %45 = vector.load %arg5[%c0_8, %c0_9, %c0_10] : memref<1x8x256xf32, #tpu.memory_space<vmem>>, vector<1x8x256xf32>
    %46 = vector.shape_cast %45 : vector<1x8x256xf32> to vector<8x256xf32>
    %47 = vector.shape_cast %44 : vector<8x256xf32> to vector<1x8x256xf32>
    tpu.vector_store %arg5[%c0_8, %c0_9, %c0_10], %47 {strides = array<i32>} : memref<1x8x256xf32, #tpu.memory_space<vmem>>, vector<1x8x256xf32>,
    %cst_11 = arith.constant dense<0.000000e+00> : vector<8xf32>
    %48 = vector.multi_reduction <add>, %44, %cst_11 [1] : vector<8x256xf32> to vector<8xf32>
    %49 = vector.shape_cast %48 : vector<8xf32> to vector<8x1xf32>
    %c0_12 = arith.constant 0 : index
    %c0_13 = arith.constant 0 : index
    %c0_14 = arith.constant 0 : index
    %50 = vector.load %arg6[%c0_12, %c0_13, %c0_14] : memref<1x8x1xf32, #tpu.memory_space<vmem>>, vector<1x8x1xf32>
    %51 = vector.shape_cast %50 : vector<1x8x1xf32> to vector<8x1xf32>
    %52 = vector.shape_cast %49 : vector<8x1xf32> to vector<1x8x1xf32>
    tpu.vector_store %arg6[%c0_12, %c0_13, %c0_14], %52 {strides = array<i32>} : memref<1x8x1xf32, #tpu.memory_space<vmem>>, vector<1x8x1xf32>,
    %53 = arith.mulf %44, %44 : vector<8x256xf32>
    %cst_15 = arith.constant dense<0.000000e+00> : vector<8xf32>
    %54 = vector.multi_reduction <add>, %53, %cst_15 [1] : vector<8x256xf32> to vector<8xf32>
    %55 = vector.shape_cast %54 : vector<8xf32> to vector<8x1xf32>
    %c0_16 = arith.constant 0 : index
    %c0_17 = arith.constant 0 : index
    %c0_18 = arith.constant 0 : index
    %56 = vector.load %arg7[%c0_16, %c0_17, %c0_18] : memref<1x8x1xf32, #tpu.memory_space<vmem>>, vector<1x8x1xf32>
    %57 = vector.shape_cast %56 : vector<1x8x1xf32> to vector<8x1xf32>
    %58 = vector.shape_cast %55 : vector<8x1xf32> to vector<1x8x1xf32>
    tpu.vector_store %arg7[%c0_16, %c0_17, %c0_18], %58 {strides = array<i32>} : memref<1x8x1xf32, #tpu.memory_space<vmem>>, vector<1x8x1xf32>,
    return
  }
  func.func @transform_0(%arg0: i32) -> (i32, i32, i32) {
    %c0_i32 = arith.constant 0 : i32
    %c0_i32_0 = arith.constant 0 : i32
    %c0_i32_1 = arith.constant 0 : i32
    return %arg0, %c0_i32, %c0_i32_0 : i32, i32, i32
  }
  func.func @transform_1(%arg0: i32) -> (i32, i32) {
    %c0_i32 = arith.constant 0 : i32
    %c0_i32_0 = arith.constant 0 : i32
    %c0_i32_1 = arith.constant 0 : i32
    return %c0_i32, %c0_i32_0 : i32, i32
  }
  func.func @transform_2(%arg0: i32) -> (i32, i32) {
    %c0_i32 = arith.constant 0 : i32
    %c0_i32_0 = arith.constant 0 : i32
    %c0_i32_1 = arith.constant 0 : i32
    return %c0_i32, %c0_i32_0 : i32, i32
  }
  func.func @transform_3(%arg0: i32) -> (i32, i32) {
    %c0_i32 = arith.constant 0 : i32
    %c0_i32_0 = arith.constant 0 : i32
    %c0_i32_1 = arith.constant 0 : i32
    return %c0_i32, %c0_i32_0 : i32, i32
  }
  func.func @transform_4(%arg0: i32) -> (i32, i32, i32) {
    %c0_i32 = arith.constant 0 : i32
    %c0_i32_0 = arith.constant 0 : i32
    %c0_i32_1 = arith.constant 0 : i32
    return %arg0, %c0_i32, %c0_i32_0 : i32, i32, i32
  }
  func.func @transform_5(%arg0: i32) -> (i32, i32, i32) {
    %c0_i32 = arith.constant 0 : i32
    %c0_i32_0 = arith.constant 0 : i32
    %c0_i32_1 = arith.constant 0 : i32
    return %arg0, %c0_i32, %c0_i32_0 : i32, i32, i32
  }
  func.func @transform_6(%arg0: i32) -> (i32, i32, i32) {
    %c0_i32 = arith.constant 0 : i32
    %c0_i32_0 = arith.constant 0 : i32
    %c0_i32_1 = arith.constant 0 : i32
    return %arg0, %c0_i32, %c0_i32_0 : i32, i32, i32
  }
}

module attributes {stable_mosaic.version = 11 : i64} {
  func.func @_bn_film_kernel(%arg0: i32, %arg1: memref<1x8x256xf32, #tpu.memory_space<vmem>>, %arg2: memref<8x1xf32, #tpu.memory_space<vmem>>, %arg3: memref<8x1xf32, #tpu.memory_space<vmem>>, %arg4: memref<1x32x1xf32, #tpu.memory_space<vmem>>, %arg5: memref<16x32xf32, #tpu.memory_space<vmem>>, %arg6: memref<16x1xf32, #tpu.memory_space<vmem>>, %arg7: memref<1x8x256xf32, #tpu.memory_space<vmem>>) attributes {dimension_semantics = [#tpu.dimension_semantics<parallel>], iteration_bounds = array<i64: 2>, scalar_prefetch = 0 : i64, scratch_operands = 0 : i64, tpu.core_type = #tpu.core_type<tc>, window_params = [{transform_indices = @transform_0, window_bounds = array<i64: 1, 8, 256>}, {pipeline_mode = #tpu.pipeline_mode<synchronous>, transform_indices = @transform_1, window_bounds = array<i64: 8, 1>}, {pipeline_mode = #tpu.pipeline_mode<synchronous>, transform_indices = @transform_2, window_bounds = array<i64: 8, 1>}, {transform_indices = @transform_3, window_bounds = array<i64: 1, 32, 1>}, {pipeline_mode = #tpu.pipeline_mode<synchronous>, transform_indices = @transform_4, window_bounds = array<i64: 16, 32>}, {pipeline_mode = #tpu.pipeline_mode<synchronous>, transform_indices = @transform_5, window_bounds = array<i64: 16, 1>}, {transform_indices = @transform_6, window_bounds = array<i64: 1, 8, 256>}]} {
    %c0 = arith.constant 0 : index
    %c0_0 = arith.constant 0 : index
    %c0_1 = arith.constant 0 : index
    %0 = vector.load %arg1[%c0, %c0_0, %c0_1] : memref<1x8x256xf32, #tpu.memory_space<vmem>>, vector<1x8x256xf32>
    %1 = vector.shape_cast %0 : vector<1x8x256xf32> to vector<8x256xf32>
    %c0_2 = arith.constant 0 : index
    %c0_3 = arith.constant 0 : index
    %c0_4 = arith.constant 0 : index
    %2 = vector.load %arg4[%c0_2, %c0_3, %c0_4] : memref<1x32x1xf32, #tpu.memory_space<vmem>>, vector<1x32x1xf32>
    %3 = vector.shape_cast %2 : vector<1x32x1xf32> to vector<32x1xf32>
    %4 = arith.negf %3 : vector<32x1xf32>
    %5 = math.exp %4 : vector<32x1xf32>
    %cst = arith.constant 1.000000e+00 : f32
    %6 = vector.broadcast %cst : f32 to vector<32x1xf32>
    %7 = arith.addf %6, %5 : vector<32x1xf32>
    %8 = arith.divf %6, %7 : vector<32x1xf32>
    %9 = arith.mulf %3, %8 : vector<32x1xf32>
    %c0_5 = arith.constant 0 : index
    %c0_6 = arith.constant 0 : index
    %10 = vector.load %arg5[%c0_5, %c0_6] : memref<16x32xf32, #tpu.memory_space<vmem>>, vector<16x32xf32>
    %cst_7 = arith.constant dense<0.000000e+00> : vector<16x1xf32>
    %11 = tpu.matmul %10, %9, %cst_7 {dimension_numbers = #tpu.dot_dimension_numbers<[1], [0], [0], [1], [0, 0, 1, 1], [], []>} : vector<16x32xf32>, vector<32x1xf32>, vector<16x1xf32> -> vector<16x1xf32>
    %c0_8 = arith.constant 0 : index
    %c0_9 = arith.constant 0 : index
    %12 = vector.load %arg6[%c0_8, %c0_9] : memref<16x1xf32, #tpu.memory_space<vmem>>, vector<16x1xf32>
    %13 = arith.addf %11, %12 : vector<16x1xf32>
    %14 = vector.extract_strided_slice %13 {offsets = [0, 0], sizes = [8, 1], strides = [1, 1]} : vector<16x1xf32> to vector<8x1xf32>
    %15 = vector.extract_strided_slice %13 {offsets = [8, 0], sizes = [8, 1], strides = [1, 1]} : vector<16x1xf32> to vector<8x1xf32>
    %cst_10 = arith.constant 1.000000e+00 : f32
    %16 = vector.broadcast %cst_10 : f32 to vector<8x1xf32>
    %17 = arith.addf %14, %16 : vector<8x1xf32>
    %c0_11 = arith.constant 0 : index
    %c0_12 = arith.constant 0 : index
    %18 = vector.load %arg2[%c0_11, %c0_12] : memref<8x1xf32, #tpu.memory_space<vmem>>, vector<8x1xf32>
    %19 = arith.mulf %18, %17 : vector<8x1xf32>
    %c0_13 = arith.constant 0 : index
    %c0_14 = arith.constant 0 : index
    %20 = vector.load %arg3[%c0_13, %c0_14] : memref<8x1xf32, #tpu.memory_space<vmem>>, vector<8x1xf32>
    %21 = arith.mulf %20, %17 : vector<8x1xf32>
    %22 = arith.addf %21, %15 : vector<8x1xf32>
    %23 = vector.broadcast %19 : vector<8x1xf32> to vector<8x256xf32>
    %24 = arith.mulf %1, %23 : vector<8x256xf32>
    %25 = vector.broadcast %22 : vector<8x1xf32> to vector<8x256xf32>
    %26 = arith.addf %24, %25 : vector<8x256xf32>
    %c0_15 = arith.constant 0 : index
    %c0_16 = arith.constant 0 : index
    %c0_17 = arith.constant 0 : index
    %27 = vector.load %arg7[%c0_15, %c0_16, %c0_17] : memref<1x8x256xf32, #tpu.memory_space<vmem>>, vector<1x8x256xf32>
    %28 = vector.shape_cast %27 : vector<1x8x256xf32> to vector<8x256xf32>
    %29 = vector.shape_cast %26 : vector<8x256xf32> to vector<1x8x256xf32>
    tpu.vector_store %arg7[%c0_15, %c0_16, %c0_17], %29 {strides = array<i32>} : memref<1x8x256xf32, #tpu.memory_space<vmem>>, vector<1x8x256xf32>,
    return
  }
  func.func @transform_0(%arg0: i32) -> (i32, i32, i32) {
    %c0_i32 = arith.constant 0 : i32
    %c0_i32_0 = arith.constant 0 : i32
    %c0_i32_1 = arith.constant 0 : i32
    return %arg0, %c0_i32, %c0_i32_0 : i32, i32, i32
  }
  func.func @transform_1(%arg0: i32) -> (i32, i32) {
    %c0_i32 = arith.constant 0 : i32
    %c0_i32_0 = arith.constant 0 : i32
    %c0_i32_1 = arith.constant 0 : i32
    return %c0_i32, %c0_i32_0 : i32, i32
  }
  func.func @transform_2(%arg0: i32) -> (i32, i32) {
    %c0_i32 = arith.constant 0 : i32
    %c0_i32_0 = arith.constant 0 : i32
    %c0_i32_1 = arith.constant 0 : i32
    return %c0_i32, %c0_i32_0 : i32, i32
  }
  func.func @transform_3(%arg0: i32) -> (i32, i32, i32) {
    %c0_i32 = arith.constant 0 : i32
    %c0_i32_0 = arith.constant 0 : i32
    %c0_i32_1 = arith.constant 0 : i32
    return %arg0, %c0_i32, %c0_i32_0 : i32, i32, i32
  }
  func.func @transform_4(%arg0: i32) -> (i32, i32) {
    %c0_i32 = arith.constant 0 : i32
    %c0_i32_0 = arith.constant 0 : i32
    %c0_i32_1 = arith.constant 0 : i32
    return %c0_i32, %c0_i32_0 : i32, i32
  }
  func.func @transform_5(%arg0: i32) -> (i32, i32) {
    %c0_i32 = arith.constant 0 : i32
    %c0_i32_0 = arith.constant 0 : i32
    %c0_i32_1 = arith.constant 0 : i32
    return %c0_i32, %c0_i32_0 : i32, i32
  }
  func.func @transform_6(%arg0: i32) -> (i32, i32, i32) {
    %c0_i32 = arith.constant 0 : i32
    %c0_i32_0 = arith.constant 0 : i32
    %c0_i32_1 = arith.constant 0 : i32
    return %arg0, %c0_i32, %c0_i32_0 : i32, i32, i32
  }
}

</mosaic_0001>

<bundles_post_ra>
// kernel: conv_withtime.3
= control target key start
LH: loop header
LB: loop body
LE: loop exit
PB: predicated region body
PF: predicated region fallthrough
CT: control target
= control target key end

     0   :  { %s598_s21 = smov 0   ;;  %s642_s0 = inlined_call_operand.vmem [shape: f32[2,8,256], index: 0, kind: input, shape index: {}]   ;;  %s643_s1 = inlined_call_operand.vmem [shape: f32[8,1], index: 1, kind: input, shape index: {}]   ;;  %s644_s2 = inlined_call_operand.vmem [shape: f32[8,1], index: 2, kind: input, shape index: {}]   ;;  %s645_s3 = inlined_call_operand.vmem [shape: f32[2,32,1], index: 3, kind: input, shape index: {}]   ;;  %s646_s4 = inlined_call_operand.vmem [shape: f32[16,32], index: 4, kind: input, shape index: {}]   ;;  %s647_s5 = inlined_call_operand.vmem [shape: f32[16,1], index: 5, kind: input, shape index: {}]   ;;  %s648_s6 = inlined_call_operand.vmem [shape: f32[2,8,256], index: 6, kind: output, shape index: {}]  }
   0x1 LB: > { %s481_s22 = sadd.s32 4294967295, %s560_s21   ;;  %p485_p0 = scmp.ge.s32.totalorder %s560_s21, 1  ;;  %s560_s21 = sphi %s598_s21, %s16_s21  }
   0x2   : > { %p222_p1 = scmp.lt.s32.totalorder %s560_s21, 3 }
   0x4   : > { %p223_p2 = pnand %p485_p0, %p222_p1 }
   0x5   : > { %p257_p3 = scmp.lt.s32.totalorder (!%p223_p2), %s481_s22, 1  ;;  %v306_v0 = vld [vmem:[%s646_s4] sm:$0xff] (!%p223_p2)  ;;  %vm310_vm0 = vcmask (!%p223_p2), 261120   ;;  %v307_v27 = vld [vmem:[%s646_s4 + $0x8] sm:$0xff] (!%p223_p2)  ;;  %v562_v28 = vmov (!%p223_p2), 0  }
   0x6   : > { %226 = sbr.rel (%p223_p2) target bundleno = 410 (0x19a), region = 44  ;;  %517 = vmatprep.mubr.msk.f32.mxu0 (!%p223_p2), %vm310_vm0, %v306_v0  ;;  %537 = vset.pattern.permute.xlu0 (!%p223_p2), %v562_v28  ;;  %v308_v29 = vld [vmem:[%s647_s5] sm:$0xff] (!%p223_p2)  ;;  %v309_v33 = vld [vmem:[%s647_s5 + $0x8] sm:$0xff] (!%p223_p2) }
   0x7   : > { %v395_v34 = vld [vmem:[%s644_s2] sm:$0xff] (!%p223_p2) }
   0x8   : > { %v393_v35 = vld [vmem:[%s643_s1] sm:$0xff] (!%p223_p2) }
   0xd   : > { %s650_s22 = smov (!%p257_p3, %s481_s22), 1 }
   0xe   : > { %s501_s25 = sshll.u32 %s650_s22, 5  ;;  %s500_s15 = sshll.u32 %s650_s22, 4 }
   0xf   : > { %s266_s28 = scalar_lea.vmem %s645_s3, %s501_s25  ;;  %s261_s18 = scalar_lea.vmem %s642_s0, %s500_s15 }
  0x10   : > { %v274_v1 = vld [vmem:[%s266_s28] sm:$0xff]  ;;  %v275_v2 = vld [vmem:[%s266_s28 + $0x8] sm:$0xff]  ;;  %v276_v3 = vld [vmem:[%s266_s28 + $0x10] sm:$0xff]  ;;  %s271_s23 = scalar_lea.vmem %s648_s6, %s500_s15 }
  0x11   : > { %v492_v4 = vmul.f32 -1.442695, %v274_v1  ;;  %v493_v5 = vmul.f32 -1.442695, %v275_v2  ;;  %v277_v6 = vld [vmem:[%s266_s28 + $0x18] sm:$0xff]  ;;  %v272_v42 = vld [vmem:[%s261_s18] sm:$0xff] }
  0x12   : > { %v494_v7 = vmul.f32 -1.442695, %v276_v3  ;;  %v495_v8 = vmul.f32 -1.442695, %v277_v6  ;;  %v273_v43 = vld [vmem:[%s261_s18 + $0x8] sm:$0xff] }
  0x13   : > { %538 = vpow2.f32 %v492_v4 }
  0x14   : > { %540 = vpow2.f32 %v493_v5 }
  0x15   : > { %542 = vpow2.f32 %v494_v7 }
  0x16   : > { %544 = vpow2.f32 %v495_v8 }
  0x1d   : > { %v539_v9 = vpop.eup %538 }
  0x1e   : > { %v541_v10 = vpop.eup %540  ;;  %v290_v11 = vadd.f32 1.0, %v539_v9 }
  0x1f   : > { %v543_v12 = vpop.eup %542  ;;  %v291_v13 = vadd.f32 1.0, %v541_v10 }
  0x20   : > { %v545_v14 = vpop.eup %544  ;;  %546 = vrcp.f32 %v290_v11  ;;  %v292_v15 = vadd.f32 1.0, %v543_v12 }
  0x21   : > { %548 = vrcp.f32 %v291_v13  ;;  %v293_v16 = vadd.f32 1.0, %v545_v14 }
  0x22   : > { %550 = vrcp.f32 %v292_v15 }
  0x23   : > { %552 = vrcp.f32 %v293_v16 }
  0x2a   : > { %v547_v17 = vpop.eup %546 }
  0x2b   : > { %v549_v18 = vpop.eup %548  ;;  %v302_v19 = vmul.f32 %v547_v17, %v274_v1 }
  0x2c   : > { %v551_v20 = vpop.eup %550  ;;  %v303_v21 = vmul.f32 %v549_v18, %v275_v2 }
  0x2d   : > { %v553_v22 = vpop.eup %552  ;;  %v304_v23 = vmul.f32 %v551_v20, %v276_v3 }
  0x2e   : > { %v520_v24 = vpack.c.bf16 %v303_v21, %v302_v19  ;;  %v305_v25 = vmul.f32 %v553_v22, %v277_v6 }
  0x30   : > { %521 = vmatprep.subr.bf16.mxu0 %v520_v24  ;;  %v524_v26 = vpack.c.bf16 %v305_v25, %v304_v23 }
  0x31   : > { %523 = vmatpush3.bf16.msra.mxu0 %v520_v24 }
  0x32   : > { %525 = vmatprep.subr.bf16.mxu0 %v524_v26 }
  0x35   : > { %527 = vmatpush3.bf16.msra.mxu0 %v524_v26 }
  0x38   : > { %518 = vmatmul.mubr.msk.f32.vlgmr.msra.gmra.mrb[0].mxu0 %vm310_vm0, %v307_v27 }
 0x10b   : > { %v519_v30 = vpop.f32.mrb[0].mxu0 }
 0x10c   : > { %v383_v31 = vpop.f32.mrb[1].mxu0  ;;  %v389_v37 = vadd.f32 %v519_v30, %v309_v33 }
 0x10d   : > { %v384_v32 = vadd.f32 %v383_v31, %v308_v29 }
 0x10f   : > { %v392_v36 = vadd.f32 1.0, %v384_v32 }
 0x111   : > { %v396_v38 = vmul.f32 %v395_v34, %v392_v36  ;;  %v394_v39 = vmul.f32 %v393_v35, %v392_v36 }
 0x113   : > { %400 = vperm.xlu0 %537, %v394_v39   ;;  %v397_v40 = vadd.f32 %v396_v38, %v389_v37 }
 0x117   : > { %407 = vperm.xlu0 %537, %v397_v40  }
 0x192   : > { %v401_v41 = vpop.permute.xlu0 %400 }
 0x193   : > { %v403_v44 = vmul.f32 %v401_v41, %v272_v42  ;;  %v404_v45 = vmul.f32 %v401_v41, %v273_v43 }
 0x196   : > { %v408_v46 = vpop.permute.xlu0 %407 }
 0x197   : > { %v410_v47 = vadd.f32 %v408_v46, %v403_v44  ;;  %v411_v48 = vadd.f32 %v408_v46, %v404_v45 }
 0x199   : > { %412 = vst [vmem:[%s271_s23] sm:$0xff] %v410_v47  ;;  %413 = vst [vmem:[%s271_s23 + $0x8] sm:$0xff] %v411_v48 }
 0x19a PF: > { %s16_s21 = sadd.s32 1, %s560_s21  }
 0x19b   : > { %p13_p4 = scmp.ge.s32.totalorder %s16_s21, 4  }
 0x19d   :  { %15 = sbr.rel (!%p13_p4) target bundleno = 1 (0x1), region = 77 }

// kernel: conv_withtime.2
= control target key start
LH: loop header
LB: loop body
LE: loop exit
PB: predicated region body
PF: predicated region fallthrough
CT: control target
= control target key end

     0   :  { %s958_s21 = smov 0   ;;  %s1081_s0 = inlined_call_operand.vmem [shape: bf16[2,4,290], index: 0, kind: input, shape index: {}]   ;;  %s1082_s1 = inlined_call_operand.vmem [shape: bf16[8,36], index: 1, kind: input, shape index: {}]   ;;  %s1083_s2 = inlined_call_operand.vmem [shape: f32[8,1], index: 2, kind: input, shape index: {}]   ;;  %s1084_s3 = inlined_call_operand.vmem [shape: bf16[3,256], index: 3, kind: input, shape index: {}]   ;;  %s1085_s4 = inlined_call_operand.vmem [shape: f32[2,8,256], index: 4, kind: output, shape index: {0}]   ;;  %s1086_s5 = inlined_call_operand.vmem [shape: f32[2,8,1], index: 5, kind: output, shape index: {1}]   ;;  %s1087_s6 = inlined_call_operand.vmem [shape: f32[2,8,1], index: 6, kind: output, shape index: {2}]  }
   0x1 LB: > { %s853_s22 = sadd.s32 4294967295, %s903_s21   ;;  %p857_p0 = scmp.ge.s32.totalorder %s903_s21, 1  ;;  %s903_s21 = sphi %s958_s21, %s17_s21  }
   0x2   : > { %p217_p1 = scmp.lt.s32.totalorder %s903_s21, 3 }
   0x4   : > { %p218_p2 = pnand %p857_p0, %p217_p1 }
   0x5   : > { %v863_v0 = vld.sshfl [vmem:[%s1084_s3] sm:$0x33 pattern:$0x76325410] (!%p218_p2)  ;;  %v288_v1 = vlaneseq (!%p218_p2)  ;;  %v905_v3 = vmov (!%p218_p2), 1983009808  }
   0x6   : > { %221 = sbr.rel (%p218_p2) target bundleno = 669 (0x29d), region = 36  ;;  %v284_v2 = vcombine.high (!%p218_p2), %v863_v0, %v863_v0  ;;  %v303_v4 = vunpack.c.l.s4 (!%p218_p2), %v905_v3  ;;  %v311_v5 = vshrl.u32 (!%p218_p2), %v863_v0, 16  ;;  %v286_v6 = vpack.i.b16 (!%p218_p2), %v863_v0, %v863_v0  ;;  %s906_s25 = smov (!%p218_p2), 2  }
   0x7   : > { %v289_v7 = vshrl.u32 (!%p218_p2), %v288_v1, 7  ;;  %s907_s26 = smov (!%p218_p2), 16   ;;  %s908_s27 = smov (!%p218_p2), 1   ;;  %vm363_vm0 = vcmask (!%p218_p2), 15360   ;;  %vm370_vm1 = vcmask (!%p218_p2), 130048   ;;  %vm384_vm2 = vcmask (!%p218_p2), 146432  }
   0x8   : > { %v293_v8 = vpack.i.b16 (!%p218_p2), %v284_v2, %v284_v2  ;;  %v304_v9 = vunpack.c.0.s8 (!%p218_p2), %v303_v4  ;;  %v312_v10 = vpack.i.b16 (!%p218_p2), %v311_v5, %v311_v5  ;;  %v318_v11 = vshrl.u32 (!%p218_p2), %v284_v2, 16  ;;  %s909_s28 = smov (!%p218_p2), 18   ;;  %s910_s29 = smov (!%p218_p2), 32  }
   0x9   : > { %v344_v12 = vsub.s32 (!%p218_p2), 1, %v289_v7  ;;  %v290_v13 = vsub.s32 (!%p218_p2), 0, %v289_v7  ;;  %s911_s30 = smov (!%p218_p2), 17   ;;  %s912_s7 = smov (!%p218_p2), 33   ;;  %vm338_vm3 = vcmask (!%p218_p2), 7168   ;;  %vm391_vm4 = vcmask (!%p218_p2), 261120  }
   0xa   : > { %v969_v14 = vsub.s32 (!%p218_p2), %v304_v9, %v289_v7  ;;  %v319_v15 = vpack.i.b16 (!%p218_p2), %v318_v11, %v318_v11  ;;  %s913_s8 = smov (!%p218_p2), 34   ;;  %p255_p3 = scmp.lt.s32.totalorder (!%p218_p2), %s853_s22, 1  ;;  %vm377_vm5 = vcmask (!%p218_p2), 138240   ;;  %vm398_vm6 = vcmask (!%p218_p2), 269312  }
   0xb   : > { %v345_v16 = vrot.slane (!%p218_p2), %v286_v6, %v344_v12  ;;  %v349_v17 = vrot.slane (!%p218_p2), %v293_v8, %v344_v12  ;;  %v291_v18 = vrot.slane (!%p218_p2), %v286_v6, %v290_v13  ;;  %v298_v19 = vrot.slane (!%p218_p2), %v293_v8, %v290_v13  ;;  %s914_s13 = smov (!%p218_p2), 126   ;;  %s915_s14 = smov (!%p218_p2), 110  }
   0xc   : > { %v317_v20 = vrot.slane (!%p218_p2), %v312_v10, %v290_v13  ;;  %v324_v21 = vrot.slane (!%p218_p2), %v319_v15, %v290_v13  ;;  %s916_s15 = smov (!%p218_p2), 112   ;;  %s917_s16 = smov (!%p218_p2), 96   ;;  %vm405_vm7 = vcmask (!%p218_p2), 277504   ;;  %vm468_vm8 = vcmask (!%p218_p2), 1031168  }
   0xd   : > { %v352_v22 = vcombine.low %v345_v16, %v349_v17  ;;  %v301_v23 = vcombine.low %v291_v18, %v298_v19  ;;  %s1089_s22 = smov (!%p255_p3, %s853_s22), 1  ;;  %s918_s17 = smov 127   ;;  %vm495_vm9 = vcmask 916480   ;;  %vm521_vm10 = vcmask 908288  }
   0xe   : > { %v327_v24 = vcombine.low %v317_v20, %v324_v21  ;;  %s869_s9 = smul.u32 6, %s1089_s22  ;;  %s919_s18 = smov 111   ;;  %vm547_vm11 = vcmask 900096   ;;  %vm441_vm12 = vcmask 1039360   ;;  %vm574_vm13 = vcmask 785408  }
   0xf   : > { %v359_v25 = vrot.slane %v352_v22, %v969_v14  ;;  %v973_v26 = vrot.slane %v301_v23, %v969_v14  ;;  %s921_s19 = smov 95   ;;  %s922_s20 = smov 94   ;;  %vm630_vm14 = vcmask 1041408   ;;  %vm637_vm15 = vcmask 1043456  }
  0x10   : > { %v334_v27 = vrot.slane %v327_v24, %v969_v14  ;;  %s259_s12 = scalar_lea.vmem %s1081_s0, %s869_s9 }
  0x11   : > { %360 = vrot.lane.b32.xlu0 %v359_v25, %s906_s25  ;;  %367 = vrot.lane.b32.xlu1 %v973_v26, %s907_s26  ;;  %v988_v30 = vld [vmem:[%s259_s12] sm:$0x3f] }
  0x15   : > { %335 = vrot.lane.b32.xlu0 %v334_v27, %s908_s27  ;;  %381 = vrot.lane.b32.xlu1 %v359_v25, %s909_s28  ;;  %s868_s27 = sshll.u32 %s1089_s22, 4 }
  0x19   : > { %388 = vrot.lane.b32.xlu0 %v973_v26, %s910_s29  ;;  %374 = vrot.lane.b32.xlu1 %v334_v27, %s911_s30  ;;  %s264_s30 = scalar_lea.vmem %s1085_s4, %s868_s27 }
  0x1d   : > { %395 = vrot.lane.b32.xlu0 %v334_v27, %s912_s7  ;;  %402 = vrot.lane.b32.xlu1 %v359_v25, %s913_s8  ;;  %s861_s7 = sshll.u32 %s1089_s22, 3 }
  0x1e   : > { %s268_s10 = scalar_lea.vmem %s1086_s5, %s861_s7 }
  0x83   : > { %v361_v28 = vpop.permute.xlu0 %360  ;;  %v368_v29 = vpop.permute.xlu1 %367 }
  0x84   : > { %v362_v31 = vrot.slane %v361_v28, 6  ;;  %v369_v32 = vrot.slane %v368_v29, 6 }
  0x86   : > { %v364_v33 = vsel %vm363_vm0, %v362_v31, %v361_v28  ;;  %v371_v34 = vsel %vm370_vm1, %v369_v32, %v368_v29  ;;  %v920_v31 = vmov 0   ;;  %vm601_vm0 = vcmask 777216  }
  0x87   : > { %v366_v35 = vmul.bf16 %v364_v33, %v988_v30  ;;  %v336_v36 = vpop.permute.xlu0 %335  ;;  %v382_v37 = vpop.permute.xlu1 %381  ;;  %v373_v39 = vmul.bf16 %v371_v34, %v988_v30  ;;  %714 = vmatprep.mubr.bf16.mxu0 %v920_v31  ;;  %896 = vset.pattern.permute.xlu0 %v920_v31  ;;  %vm642_vm1 = vcmask 1045504  }
  0x88   : > { %v383_v38 = vrot.slane %v382_v37, 6  ;;  %v337_v41 = vrot.slane %v336_v36, 6 }
  0x89   : > { %v452_v40 = vrot.slane %v366_v35, %v969_v14  ;;  %v472_v47 = vcombine.low %v373_v39, %v373_v39  ;;  %v445_v62 = vcombine.high %v366_v35, %v366_v35  ;;  %v486_v4 = vrot.slane %v373_v39, %v969_v14 }
  0x8a   : > { %v385_v42 = vsel %vm384_vm2, %v383_v38, %v382_v37  ;;  %v339_v49 = vsel %vm338_vm3, %v337_v41, %v336_v36  ;;  %v666_v37 = vld [vmem:[%s1083_s2] sm:$0xff]  ;;  %vm627_vm2 = vcmask 769024  }
  0x8b   : > { %v387_v43 = vmul.bf16 %v385_v42, %v988_v30  ;;  %v389_v44 = vpop.permute.xlu0 %388  ;;  %464 = vrot.lane.b32.xlu1 %v452_v40, %s914_s13  ;;  %v375_v45 = vpop.permute.xlu1 %374  ;;  %v341_v53 = vmul.bf16 %v339_v49, %v988_v30  ;;  %v479_v55 = vrot.slane %v472_v47, %v969_v14  ;;  %v460_v2 = vcombine.low %v452_v40, %v452_v40 }
  0x8c   : > { %v390_v46 = vrot.slane %v389_v44, 6  ;;  %v376_v51 = vrot.slane %v375_v45, 6  ;;  %v459_v5 = vrot.slane %v445_v62, %v969_v14  ;;  %v488_v8 = vcombine.low %v486_v4, %v486_v4 }
  0x8d   : > { %v539_v48 = vrot.slane %v387_v43, %v969_v14  ;;  %v525_v54 = vcombine.low %v387_v43, %v387_v43  ;;  %v419_v58 = vcombine.low %v341_v53, %v341_v53  ;;  %v433_v61 = vrot.slane %v341_v53, %v969_v14 }
  0x8e   : > { %v392_v50 = vsel %vm391_vm4, %v390_v46, %v389_v44  ;;  %v378_v57 = vsel %vm377_vm5, %v376_v51, %v375_v45  ;;  %v461_v9 = vcombine.low %v459_v5, %v459_v5  ;;  %v487_v12 = vcombine.low %v479_v55, %v479_v55 }
  0x8f   : > { %v394_v52 = vmul.bf16 %v392_v50, %v988_v30  ;;  %545 = vrot.lane.b32.xlu0 %v539_v48, %s915_s14  ;;  %v380_v59 = vmul.bf16 %v378_v57, %v988_v30  ;;  %v532_v60 = vrot.slane %v525_v54, %v969_v14  ;;  %v426_v1 = vrot.slane %v419_v58, %v969_v14  ;;  %v396_v6 = vpop.permute.xlu0 %395  ;;  %v403_v16 = vpop.permute.xlu1 %402 }
  0x90   : > { %v397_v10 = vrot.slane %v396_v6, 6  ;;  %v404_v20 = vrot.slane %v403_v16, 6  ;;  %v310_v50 = vmul.bf16 %v973_v26, %v988_v30  ;;  %vm672_vm4 = vcmask 293888  }
  0x91   : > { %v558_v56 = vrot.slane %v394_v52, %v969_v14  ;;  %v499_v63 = vcombine.high %v380_v59, %v380_v59  ;;  %v506_v0 = vrot.slane %v380_v59, %v969_v14  ;;  %v551_v7 = vcombine.high %v394_v52, %v394_v52 }
  0x92   : > { %v399_v15 = vsel %vm398_vm6, %v397_v10, %v396_v6  ;;  %v540_v22 = vcombine.high %v532_v60, %v532_v60  ;;  %v434_v23 = vcombine.high %v426_v1, %v426_v1  ;;  %v406_v25 = vsel %vm405_vm7, %v404_v20, %v403_v16 }
  0x93   : > { %491 = vrot.lane.b32.xlu0 %v479_v55, %s916_s15  ;;  %570 = vrot.lane.b32.xlu1 %v558_v56, %s917_s16  ;;  %v513_v3 = vrot.slane %v499_v63, %v969_v14  ;;  %v566_v11 = vcombine.low %v558_v56, %v558_v56  ;;  %v565_v13 = vrot.slane %v551_v7, %v969_v14 }
  0x94   : > { %v401_v17 = vmul.bf16 %v399_v15, %v988_v30  ;;  %v514_v18 = vcombine.high %v506_v0, %v506_v0  ;;  %v408_v27 = vmul.bf16 %v406_v25, %v988_v30  ;;  %v416_v53 = vrot.slane %v310_v50, %v969_v14 }
  0x95   : > { %v567_v19 = vcombine.low %v565_v13, %v565_v13 }
  0x96   : > { %v578_v21 = vcombine.low %v401_v17, %v401_v17  ;;  %v592_v24 = vrot.slane %v401_v17, %v969_v14  ;;  %v605_v32 = vcombine.high %v408_v27, %v408_v27  ;;  %v612_v33 = vrot.slane %v408_v27, %v969_v14 }
  0x97   : > { %541 = vrot.lane.b32.xlu0 %v532_v60, %s915_s14  ;;  %439 = vrot.lane.b32.xlu1 %v433_v61, %s918_s17  ;;  %v417_v56 = vcombine.high %v416_v53, %v416_v53 }
  0x98   : > { %v594_v28 = vcombine.low %v592_v24, %v592_v24  ;;  %v585_v29 = vrot.slane %v578_v21, %v969_v14  ;;  %v619_v35 = vrot.slane %v605_v32, %v969_v14  ;;  %v620_v36 = vcombine.high %v612_v33, %v612_v33 }
  0x9a   : > { %v593_v34 = vcombine.low %v585_v29, %v585_v29 }
  0x9b   : > { %515 = vrot.lane.b32.xlu1 %v506_v0, %s919_s18  ;;  %435 = vrot.lane.b32.xlu0 %v426_v1, %s918_s17 }
  0x9f   : > { %462 = vrot.lane.b32.xlu1 %v460_v2, %s914_s13  ;;  %519 = vrot.lane.b32.xlu0 %v513_v3, %s919_s18 }
  0xa3   : > { %493 = vrot.lane.b32.xlu1 %v488_v8, %s916_s15  ;;  %466 = vrot.lane.b32.xlu0 %v461_v9, %s914_s13  ;;  %s272_s13 = scalar_lea.vmem %s1087_s6, %s861_s7 }
  0xa7   : > { %568 = vrot.lane.b32.xlu1 %v566_v11, %s917_s16  ;;  %489 = vrot.lane.b32.xlu0 %v487_v12, %s916_s15 }
  0xab   : > { %517 = vrot.lane.b32.xlu1 %v514_v18, %s919_s18  ;;  %572 = vrot.lane.b32.xlu0 %v567_v19, %s917_s16 }
  0xaf   : > { %543 = vrot.lane.b32.xlu1 %v540_v22, %s915_s14  ;;  %437 = vrot.lane.b32.xlu0 %v434_v23, %s918_s17 }
  0xb3   : > { %599 = vrot.lane.b32.xlu1 %v594_v28, %s921_s19  ;;  %597 = vrot.lane.b32.xlu0 %v585_v29, %s921_s19  ;;  %v665_v29 = vld [vmem:[%s1082_s1] sm:$0xf] }
  0xb7   : > { %621 = vrot.lane.b32.xlu1 %v612_v33, %s922_s20  ;;  %595 = vrot.lane.b32.xlu0 %v593_v34, %s921_s19 }
  0xbb   : > { %625 = vrot.lane.b32.xlu1 %v619_v35, %s922_s20  ;;  %623 = vrot.lane.b32.xlu0 %v620_v36, %s922_s20 }
  0xbf   : > { %669 = vperm.xlu0 %896, %v666_v37  }
  0xfd   : > { %v465_v38 = vpop.permute.xlu1 %464 }
 0x101   : > { %v546_v39 = vpop.permute.xlu0 %545 }
 0x105   : > { %v492_v40 = vpop.permute.xlu0 %491  ;;  %v571_v41 = vpop.permute.xlu1 %570 }
 0x109   : > { %v542_v42 = vpop.permute.xlu0 %541  ;;  %v440_v43 = vpop.permute.xlu1 %439 }
 0x10d   : > { %v516_v44 = vpop.permute.xlu1 %515  ;;  %v436_v45 = vpop.permute.xlu0 %435 }
 0x111   : > { %v463_v46 = vpop.permute.xlu1 %462  ;;  %v520_v47 = vpop.permute.xlu0 %519 }
 0x112   : > { %v469_v57 = vsel %vm468_vm8, %v463_v46, %v465_v38 }
 0x115   : > { %v494_v48 = vpop.permute.xlu1 %493  ;;  %v467_v49 = vpop.permute.xlu0 %466 }
 0x116   : > { %v497_v58 = vsel %vm495_vm9, %v492_v40, %v494_v48  ;;  %v470_v62 = vsel %vm468_vm8, %v465_v38, %v467_v49 }
 0x119   : > { %v569_v51 = vpop.permute.xlu1 %568  ;;  %v490_v52 = vpop.permute.xlu0 %489 }
 0x11a   : > { %v496_v2 = vsel %vm495_vm9, %v490_v52, %v492_v40  ;;  %v575_v17 = vsel %vm574_vm13, %v569_v51, %v571_v41 }
 0x11d   : > { %v518_v54 = vpop.permute.xlu1 %517  ;;  %v573_v55 = vpop.permute.xlu0 %572 }
 0x11e   : > { %v523_v14 = vsel %vm521_vm10, %v518_v54, %v520_v47  ;;  %v576_v6 = vsel %vm574_vm13, %v571_v41, %v573_v55  ;;  %v522_v11 = vsel %vm521_vm10, %v516_v44, %v518_v54 }
 0x121   : > { %v544_v26 = vpop.permute.xlu1 %543  ;;  %v438_v30 = vpop.permute.xlu0 %437 }
 0x122   : > { %v549_v59 = vsel %vm547_vm11, %v544_v26, %v546_v39  ;;  %v442_v60 = vsel %vm441_vm12, %v436_v45, %v438_v30  ;;  %v443_v61 = vsel %vm441_vm12, %v438_v30, %v440_v43  ;;  %v548_v3 = vsel %vm547_vm11, %v542_v42, %v544_v26 }
 0x123   : > { %v654_v63 = vsel %vm630_vm14, %v523_v14, %v549_v59  ;;  %v633_v0 = vsel %vm630_vm14, %v416_v53, %v442_v60  ;;  %v636_v1 = vsel %vm630_vm14, %v417_v56, %v443_v61  ;;  %v651_v15 = vsel %vm630_vm14, %v522_v11, %v548_v3 }
 0x124   : > { %v641_v4 = vsel %vm637_vm15, %v636_v1, %v470_v62  ;;  %v639_v5 = vsel %vm637_vm15, %v633_v0, %v469_v57  ;;  %v658_v13 = vsel %vm637_vm15, %v654_v63, %v576_v6  ;;  %v656_v21 = vsel %vm637_vm15, %v651_v15, %v575_v17 }
 0x125   : > { %v600_v7 = vpop.permute.xlu1 %599  ;;  %v598_v8 = vpop.permute.xlu0 %597  ;;  %v647_v9 = vsel %vm642_vm1, %v641_v4, %v497_v58  ;;  %v644_v10 = vsel %vm642_vm1, %v639_v5, %v496_v2 }
 0x126   : > { %v603_v12 = vsel %vm601_vm0, %v598_v8, %v600_v7  ;;  %682 = vmatprep.subr.bf16.mxu0 %v647_v9 }
 0x127   : > { %683 = vmatpush1.bf16.msra.mxu0 %v644_v10  ;;  %v663_v16 = vsel %vm642_vm1, %v658_v13, %v603_v12 }
 0x128   : > { %684 = vmatprep.subr.bf16.mxu0 %v663_v16 }
 0x129   : > { %v622_v18 = vpop.permute.xlu1 %621  ;;  %v596_v19 = vpop.permute.xlu0 %595 }
 0x12a   : > { %v602_v20 = vsel %vm601_vm0, %v596_v19, %v598_v8 }
 0x12b   : > { %v660_v22 = vsel %vm642_vm1, %v656_v21, %v602_v20 }
 0x12c   : > { %685 = vmatpush1.bf16.msra.mxu0 %v660_v22 }
 0x12d   : > { %v626_v23 = vpop.permute.xlu1 %625  ;;  %v624_v24 = vpop.permute.xlu0 %623 }
 0x12e   : > { %v628_v25 = vsel %vm627_vm2, %v622_v18, %v624_v24  ;;  %v629_v27 = vsel %vm627_vm2, %v624_v24, %v626_v23 }
 0x12f   : > { %864 = vmatprep.subr.msk.bf16.mxu0 %vm630_vm14, %v629_v27  ;;  %v677_v28 = vsel %vm630_vm14, %v628_v25, 0 }
 0x130   : > { %687 = vmatpush1.bf16.msra.mxu0 %v677_v28 }
 0x133   : > { %865 = vmatmul.mubr.msk.bf16.vlgmr.msra.gmra.mrb[0].mxu0 %vm672_vm4, %v665_v29 }
 0x13e   : > { %v670_v31 = vpop.permute.xlu0 %669 }
 0x206   : > { %v716_v32 = vpop.f32.mrb[0].mxu0 }
 0x207   : > { %v717_v33 = vadd.f32 %v716_v32, %v670_v31  ;;  %v718_v34 = vpop.f32.mrb[1].mxu0 }
 0x208   : > { %v719_v35 = vadd.f32 %v718_v34, %v670_v31  ;;  %v720_v36 = vpop.f32.mrb[2].mxu0 }
 0x209   : > { %723 = vst [vmem:[%s264_s30] sm:$0xff] %v717_v33  ;;  %v721_v37 = vpop.f32.mrb[3].mxu0  ;;  %v730_v38 = vmul.f32 %v717_v33, %v717_v33 }
 0x20a   : > { %724 = vst [vmem:[%s264_s30 + $0x8] sm:$0xff] %v719_v35  ;;  %v725_v39 = vadd.f32 %v719_v35, %v717_v33  ;;  %v731_v40 = vmul.f32 %v719_v35, %v719_v35 }
 0x20c   : > { %726 = vadd.xlane.f32.xlu1 %v725_v39  ;;  %v732_v41 = vadd.f32 %v731_v40, %v730_v38 }
 0x20e   : > { %733 = vadd.xlane.f32.xlu0 %v732_v41 }
 0x299   : > { %v727_v42 = vpop.xlane.xlu1 %726 }
 0x29a   : > { %729 = vst.msk [vmem:[%s268_s10] sm:$0xff] %vm338_vm3, %v727_v42 }
 0x29b   : > { %v734_v43 = vpop.xlane.xlu0 %733 }
 0x29c   : > { %735 = vst.msk [vmem:[%s272_s13] sm:$0xff] %vm338_vm3, %v734_v43 }
 0x29d PF: > { %s17_s21 = sadd.s32 1, %s903_s21  }
 0x29e   : > { %p14_p4 = scmp.ge.s32.totalorder %s17_s21, 4  }
 0x2a0   :  { %16 = sbr.rel (!%p14_p4) target bundleno = 1 (0x1), region = 90 }

</bundles_post_ra>
